<compile_context>
chip_gen: v7x
topology: tpu7x:2x2x1
jax: 0.10.0
libtpu: 0.0.40
codegen_flags: <defaults>
</compile_context>

<pallas_src>
import jax
import jax.numpy as jnp
from jax import lax
from jax.experimental import pallas as pl
from jax.experimental.pallas import tpu as pltpu


def _local_pos_enc_kernel(pos_ref, emb_ref, out_ref):
    # pos_ref: (TM, 1) int32  -- masked / padded rows hold -1
    # emb_ref: (TK, D)        -- table tile for this k step (resident if TK == T)
    # out_ref: (TM, D)        -- output tile, resident in VMEM across the k axis
    tm = out_ref.shape[0]
    tk = emb_ref.shape[0]
    k = pl.program_id(1)

    # Position relative to this table tile; the -1 sentinel stays negative and
    # therefore never matches, giving an all-zero one-hot row (masked / pad rows).
    rel = pos_ref[...] - k * tk                                        # (TM, 1)
    iota = lax.broadcasted_iota(jnp.int32, (tm, tk), dimension=1)      # (TM, TK)
    # Fused select: one-hot built directly in the table dtype
    # (no bool->float convert, no separate mask multiply).
    one_hot = jnp.where(iota == rel,
                        jnp.ones((), emb_ref.dtype),
                        jnp.zeros((), emb_ref.dtype))                  # (TM, TK)

    partial = jnp.dot(one_hot, emb_ref[...],
                      preferred_element_type=jnp.float32)              # (TM, D)

    @pl.when(k == 0)
    def _():
        out_ref[...] = partial.astype(out_ref.dtype)

    @pl.when(k != 0)
    def _():
        out_ref[...] += partial.astype(out_ref.dtype)


def local_position_encoding(obs_pos, obs_mask, embedding_table, *,
                            tm=1024, out_dtype=None):
    """obs_pos: (B, S) int; obs_mask: (B, 1, S) 0/1 mask; embedding_table: (T, D).

    obs_mask is interpreted as a boolean mask (nonzero => keep), matching the
    0/1 observation mask of the GATO module.
    """
    B, S = obs_pos.shape
    T, D = embedding_table.shape
    N = B * S
    if out_dtype is None:
        out_dtype = embedding_table.dtype
    out_itemsize = jnp.dtype(out_dtype).itemsize
    emb_itemsize = jnp.dtype(embedding_table.dtype).itemsize

    # ---- Row tiling: TM multiple of 8; at least 2 tiles whenever possible so
    #      the "parallel" axis keeps both v7x TensorCores busy.
    n_rounded = ((max(N, 1) + 7) // 8) * 8
    tm_req = max(8, (int(tm) // 8) * 8)
    tm_req = min(tm_req, n_rounded)
    num_row_tiles = pl.cdiv(n_rounded, tm_req)
    if n_rounded >= 16:
        num_row_tiles = max(num_row_tiles, 2)
    tm = ((pl.cdiv(n_rounded, num_row_tiles) + 7) // 8) * 8
    n_pad = num_row_tiles * tm

    # ---- Table tiling over T only when the table is big; small tables stay
    #      fully resident with a constant block index (fast path).
    table_bytes = T * D * emb_itemsize
    if table_bytes <= (4 << 20):
        tk = T
    else:
        tk = max(8, ((2 << 20) // (D * emb_itemsize)) // 8 * 8)
        tk = min(tk, ((T + 7) // 8) * 8)
    num_k_tiles = pl.cdiv(T, tk)

    # ---- Fold the 0/1 mask into the positions (mask == 0 -> sentinel -1);
    #      pad rows also get -1.  Drops the mask DMA stream entirely.
    pos_flat = obs_pos.reshape(N).astype(jnp.int32)
    mask_flat = obs_mask.reshape(N)
    pos_masked = jnp.where(mask_flat != 0, pos_flat, jnp.int32(-1))
    if n_pad != N:
        pos_masked = jnp.pad(pos_masked, (0, n_pad - N), constant_values=-1)
    pos2d = pos_masked.reshape(n_pad, 1)

    # ---- Compiler params: row axis parallel, reduction (T) axis arbitrary.
    #      Raise the scoped-VMEM limit only when the working set nears v5e's
    #      16 MiB default.
    emb_bufs = 1 if num_k_tiles == 1 else 2
    vmem_est = (emb_bufs * tk * D * emb_itemsize        # table block(s)
                + 2 * tm * D * out_itemsize             # double-buffered output
                + 2 * tm * 4                            # positions
                + tm * max(tk, 128) * 4                 # one-hot temp
                + tm * D * 4)                           # f32 partial
    cp_kwargs = dict(dimension_semantics=("parallel", "arbitrary"))
    if vmem_est > (12 << 20):
        cp_kwargs["vmem_limit_bytes"] = min(int(vmem_est) + (8 << 20), 100 << 20)
    compiler_params = pltpu.CompilerParams(**cp_kwargs)

    def build(single_buffer_table):
        emb_kwargs = {}
        if single_buffer_table:
            # Constant block index across the whole grid -> double-buffering the
            # table is pure VMEM waste (biggest relief on v7x's 64 MiB VMEM).
            emb_kwargs["pipeline_mode"] = pl.Buffered(1)
        grid_spec = pltpu.PrefetchScalarGridSpec(
            num_scalar_prefetch=0,
            grid=(num_row_tiles, num_k_tiles),
            in_specs=[
                pl.BlockSpec((tm, 1), lambda i, k: (i, 0)),             # positions
                pl.BlockSpec((tk, D), lambda i, k: (k, 0), **emb_kwargs),  # table tile
            ],
            out_specs=pl.BlockSpec((tm, D), lambda i, k: (i, 0)),       # resident across k
        )
        return pl.pallas_call(
            _local_pos_enc_kernel,
            grid_spec=grid_spec,
            out_shape=jax.ShapeDtypeStruct((n_pad, D), out_dtype),
            compiler_params=compiler_params,
        )

    if num_k_tiles == 1:
        try:
            out_flat = build(True)(pos2d, embedding_table)
        except Exception:
            # pl.Buffered(1) not supported on this jax version -> default buffering.
            out_flat = build(False)(pos2d, embedding_table)
    else:
        out_flat = build(False)(pos2d, embedding_table)

    return out_flat[:N].reshape(B, S, D)


if __name__ == "__main__":
    # GatoConfig-like hyperparameters (small, synthetic)
    token_sequence_length = 16   # embedding vocabulary size (T)
    layer_width = 128            # feature dim (D, lane-aligned)
    B, S = 2, 8

    key = jax.random.PRNGKey(0)
    k_emb, k_pos, k_mask = jax.random.split(key, 3)

    # Deterministic "trained" parameter: nn.Embedding weight (T, D)
    embedding_table = (
        0.02 * jax.random.normal(k_emb, (token_sequence_length, layer_width))
    ).astype(jnp.float32)

    # Inputs: positions in [0, token_sequence_length), 0/1 mask of shape (B, 1, S)
    obs_pos = jax.random.randint(
        k_pos, (B, S), 0, token_sequence_length, dtype=jnp.int32
    )
    obs_mask = jax.random.bernoulli(k_mask, 0.7, (B, 1, S)).astype(jnp.int32)

    out = local_position_encoding(obs_pos, obs_mask, embedding_table)
    out = jax.block_until_ready(out)

    # Pure-JAX reference of the PyTorch forward:
    # embed * (mask.float().transpose(-1,-2) @ ones(B,1,D))
    embed_ref = embedding_table[obs_pos]                       # (B, S, D)
    ones = jnp.ones((B, 1, layer_width), jnp.float32)
    mask_ref = jnp.matmul(
        jnp.swapaxes(obs_mask.astype(jnp.float32), -1, -2), ones
    )                                                          # (B, S, D)
    ref = embed_ref * mask_ref

    assert out.shape == (B, S, layer_width)
    assert jnp.allclose(out, ref, atol=1e-6), "mismatch vs reference"
    print("KERNEL_OK")
</pallas_src>

<mosaic_0001>
module attributes {stable_mosaic.version = 11 : i64} {
  func.func @_local_pos_enc_kernel(%arg0: i32, %arg1: i32, %arg2: memref<8x1xi32, #tpu.memory_space<vmem>>, %arg3: memref<16x128xf32, #tpu.memory_space<vmem>>, %arg4: memref<8x128xf32, #tpu.memory_space<vmem>>) attributes {dimension_semantics = [#tpu.dimension_semantics<parallel>, #tpu.dimension_semantics<arbitrary>], iteration_bounds = array<i64: 2, 1>, scalar_prefetch = 0 : i64, scratch_operands = 0 : i64, tpu.core_type = #tpu.core_type<tc>, window_params = [{transform_indices = @transform_0, window_bounds = array<i64: 8, 1>}, {pipeline_mode = #tpu.pipeline_mode<synchronous>, transform_indices = @transform_1, window_bounds = array<i64: 16, 128>}, {transform_indices = @transform_2, window_bounds = array<i64: 8, 128>}]} {
    %c0 = arith.constant 0 : index
    %c0_0 = arith.constant 0 : index
    %0 = vector.load %arg2[%c0, %c0_0] : memref<8x1xi32, #tpu.memory_space<vmem>>, vector<8x1xi32>
    %c16_i32 = arith.constant 16 : i32
    %1 = arith.muli %arg1, %c16_i32 : i32
    %2 = vector.broadcast %1 : i32 to vector<8x1xi32>
    %3 = arith.subi %0, %2 : vector<8x1xi32>
    %4 = tpu.iota {dimensions = array<i32: 1>} : vector<8x16xi32>
    %5 = vector.broadcast %3 : vector<8x1xi32> to vector<8x16xi32>
    %6 = arith.cmpi eq, %4, %5 : vector<8x16xi32>
    %cst = arith.constant 1.000000e+00 : f32
    %cst_1 = arith.constant 0.000000e+00 : f32
    %7 = vector.broadcast %cst : f32 to vector<8x16xf32>
    %8 = vector.broadcast %cst_1 : f32 to vector<8x16xf32>
    %9 = arith.select %6, %7, %8 : vector<8x16xi1>, vector<8x16xf32>
    %c0_2 = arith.constant 0 : index
    %c0_3 = arith.constant 0 : index
    %10 = vector.load %arg3[%c0_2, %c0_3] : memref<16x128xf32, #tpu.memory_space<vmem>>, vector<16x128xf32>
    %cst_4 = arith.constant dense<0.000000e+00> : vector<8x128xf32>
    %11 = tpu.matmul %9, %10, %cst_4 {dimension_numbers = #tpu.dot_dimension_numbers<[1], [0], [0], [1], [0, 0, 1, 1], [], []>} : vector<8x16xf32>, vector<16x128xf32>, vector<8x128xf32> -> vector<8x128xf32>
    %c0_i32 = arith.constant 0 : i32
    %12 = arith.cmpi eq, %arg1, %c0_i32 : i32
    %13 = arith.extui %12 : i1 to i32
    %c0_i32_5 = arith.constant 0 : i32
    %14 = arith.cmpi ne, %13, %c0_i32_5 : i32
    scf.if %14 {
      %c0_8 = arith.constant 0 : index
      %c0_9 = arith.constant 0 : index
      %18 = vector.load %arg4[%c0_8, %c0_9] : memref<8x128xf32, #tpu.memory_space<vmem>>, vector<8x128xf32>
      tpu.vector_store %arg4[%c0_8, %c0_9], %11 {strides = array<i32>} : memref<8x128xf32, #tpu.memory_space<vmem>>, vector<8x128xf32>,
    } else {
    }
    %c0_i32_6 = arith.constant 0 : i32
    %15 = arith.cmpi ne, %arg1, %c0_i32_6 : i32
    %16 = arith.extui %15 : i1 to i32
    %c0_i32_7 = arith.constant 0 : i32
    %17 = arith.cmpi ne, %16, %c0_i32_7 : i32
    scf.if %17 {
      %c0_8 = arith.constant 0 : index
      %c0_9 = arith.constant 0 : index
      %18 = vector.load %arg4[%c0_8, %c0_9] : memref<8x128xf32, #tpu.memory_space<vmem>>, vector<8x128xf32>
      %19 = arith.addf %18, %11 : vector<8x128xf32>
      %c0_10 = arith.constant 0 : index
      %c0_11 = arith.constant 0 : index
      %20 = vector.load %arg4[%c0_10, %c0_11] : memref<8x128xf32, #tpu.memory_space<vmem>>, vector<8x128xf32>
      tpu.vector_store %arg4[%c0_10, %c0_11], %19 {strides = array<i32>} : memref<8x128xf32, #tpu.memory_space<vmem>>, vector<8x128xf32>,
    } else {
    }
    return
  }
  func.func @transform_0(%arg0: i32, %arg1: i32) -> (i32, i32) {
    %c0_i32 = arith.constant 0 : i32
    %c0_i32_0 = arith.constant 0 : i32
    return %arg0, %c0_i32 : i32, i32
  }
  func.func @transform_1(%arg0: i32, %arg1: i32) -> (i32, i32) {
    %c0_i32 = arith.constant 0 : i32
    %c0_i32_0 = arith.constant 0 : i32
    return %arg1, %c0_i32 : i32, i32
  }
  func.func @transform_2(%arg0: i32, %arg1: i32) -> (i32, i32) {
    %c0_i32 = arith.constant 0 : i32
    %c0_i32_0 = arith.constant 0 : i32
    return %arg0, %c0_i32 : i32, i32
  }
}

module attributes {stable_mosaic.version = 11 : i64} {
  func.func @_local_pos_enc_kernel(%arg0: i32, %arg1: i32, %arg2: memref<8x1xi32, #tpu.memory_space<vmem>>, %arg3: memref<16x128xf32, #tpu.memory_space<vmem>>, %arg4: memref<8x128xf32, #tpu.memory_space<vmem>>) attributes {dimension_semantics = [#tpu.dimension_semantics<parallel>, #tpu.dimension_semantics<arbitrary>], iteration_bounds = array<i64: 2, 1>, scalar_prefetch = 0 : i64, scratch_operands = 0 : i64, tpu.core_type = #tpu.core_type<tc>, window_params = [{transform_indices = @transform_0, window_bounds = array<i64: 8, 1>}, {transform_indices = @transform_1, window_bounds = array<i64: 16, 128>}, {transform_indices = @transform_2, window_bounds = array<i64: 8, 128>}]} {
    %c0 = arith.constant 0 : index
    %c0_0 = arith.constant 0 : index
    %0 = vector.load %arg2[%c0, %c0_0] : memref<8x1xi32, #tpu.memory_space<vmem>>, vector<8x1xi32>
    %c16_i32 = arith.constant 16 : i32
    %1 = arith.muli %arg1, %c16_i32 : i32
    %2 = vector.broadcast %1 : i32 to vector<8x1xi32>
    %3 = arith.subi %0, %2 : vector<8x1xi32>
    %4 = tpu.iota {dimensions = array<i32: 1>} : vector<8x16xi32>
    %5 = vector.broadcast %3 : vector<8x1xi32> to vector<8x16xi32>
    %6 = arith.cmpi eq, %4, %5 : vector<8x16xi32>
    %cst = arith.constant 1.000000e+00 : f32
    %cst_1 = arith.constant 0.000000e+00 : f32
    %7 = vector.broadcast %cst : f32 to vector<8x16xf32>
    %8 = vector.broadcast %cst_1 : f32 to vector<8x16xf32>
    %9 = arith.select %6, %7, %8 : vector<8x16xi1>, vector<8x16xf32>
    %c0_2 = arith.constant 0 : index
    %c0_3 = arith.constant 0 : index
    %10 = vector.load %arg3[%c0_2, %c0_3] : memref<16x128xf32, #tpu.memory_space<vmem>>, vector<16x128xf32>
    %cst_4 = arith.constant dense<0.000000e+00> : vector<8x128xf32>
    %11 = tpu.matmul %9, %10, %cst_4 {dimension_numbers = #tpu.dot_dimension_numbers<[1], [0], [0], [1], [0, 0, 1, 1], [], []>} : vector<8x16xf32>, vector<16x128xf32>, vector<8x128xf32> -> vector<8x128xf32>
    %c0_i32 = arith.constant 0 : i32
    %12 = arith.cmpi eq, %arg1, %c0_i32 : i32
    %13 = arith.extui %12 : i1 to i32
    %c0_i32_5 = arith.constant 0 : i32
    %14 = arith.cmpi ne, %13, %c0_i32_5 : i32
    scf.if %14 {
      %c0_8 = arith.constant 0 : index
      %c0_9 = arith.constant 0 : index
      %18 = vector.load %arg4[%c0_8, %c0_9] : memref<8x128xf32, #tpu.memory_space<vmem>>, vector<8x128xf32>
      tpu.vector_store %arg4[%c0_8, %c0_9], %11 {strides = array<i32>} : memref<8x128xf32, #tpu.memory_space<vmem>>, vector<8x128xf32>,
    } else {
    }
    %c0_i32_6 = arith.constant 0 : i32
    %15 = arith.cmpi ne, %arg1, %c0_i32_6 : i32
    %16 = arith.extui %15 : i1 to i32
    %c0_i32_7 = arith.constant 0 : i32
    %17 = arith.cmpi ne, %16, %c0_i32_7 : i32
    scf.if %17 {
      %c0_8 = arith.constant 0 : index
      %c0_9 = arith.constant 0 : index
      %18 = vector.load %arg4[%c0_8, %c0_9] : memref<8x128xf32, #tpu.memory_space<vmem>>, vector<8x128xf32>
      %19 = arith.addf %18, %11 : vector<8x128xf32>
      %c0_10 = arith.constant 0 : index
      %c0_11 = arith.constant 0 : index
      %20 = vector.load %arg4[%c0_10, %c0_11] : memref<8x128xf32, #tpu.memory_space<vmem>>, vector<8x128xf32>
      tpu.vector_store %arg4[%c0_10, %c0_11], %19 {strides = array<i32>} : memref<8x128xf32, #tpu.memory_space<vmem>>, vector<8x128xf32>,
    } else {
    }
    return
  }
  func.func @transform_0(%arg0: i32, %arg1: i32) -> (i32, i32) {
    %c0_i32 = arith.constant 0 : i32
    %c0_i32_0 = arith.constant 0 : i32
    return %arg0, %c0_i32 : i32, i32
  }
  func.func @transform_1(%arg0: i32, %arg1: i32) -> (i32, i32) {
    %c0_i32 = arith.constant 0 : i32
    %c0_i32_0 = arith.constant 0 : i32
    return %arg1, %c0_i32 : i32, i32
  }
  func.func @transform_2(%arg0: i32, %arg1: i32) -> (i32, i32) {
    %c0_i32 = arith.constant 0 : i32
    %c0_i32_0 = arith.constant 0 : i32
    return %arg0, %c0_i32 : i32, i32
  }
}

</mosaic_0001>

<bundles_post_ra>
// kernel: tpu_custom_call.1
= control target key start
LH: loop header
LB: loop body
LE: loop exit
PB: predicated region body
PF: predicated region fallthrough
CT: control target
= control target key end

     0   :  { %7 = vsyncpa [#allocation3], 0  ;;  %s672_s0 = inlined_call_operand.vmem [shape: s32[16,1], index: 0, kind: input, shape index: {}]   ;;  %s673_s1 = inlined_call_operand.vmem [shape: f32[16,128], index: 1, kind: input, shape index: {}]   ;;  %s674_s2 = inlined_call_operand.hbm [shape: f32[16,128], index: 2, kind: output, shape index: {}]  }
   0x1   :  { %9 = vsyncpa [#allocation3 + $0x1], 0  ;;  %s554_s9 = smov 0   ;;  %s556_s10 = smov 0  }
   0x2   :  { %s558_s11 = smov 0   ;;  %s560_s12 = smov 0  }
   0x3   :  { %s562_s13 = smov 0   ;;  %s564_s14 = smov 0  }
   0x4 LB: > { %s368_s15 = sadd.s32 4294967295, %s532_s14   ;;  %s369_s16 = sadd.s32 4294967294, %s532_s14   ;;  %s532_s14 = sphi %s564_s14, %s15_s14   ;;  %s528_s13 = sphi %s562_s13, %s681_s13   ;;  %s524_s12 = sphi %s560_s12, %s680_s12   ;;  %s520_s11 = sphi %s558_s11, %s679_s11   ;;  %s516_s10 = sphi %s556_s10, %s678_s10   ;;  %s512_s9 = sphi %s554_s9, %s677_s9  }
   0x5   : > { %s27_s17 = sadd.s32 1, %s528_s13  ;;  %s86_s18 = sadd.s32 1, %s520_s11 }
   0x6   : > { %p29_p0 = scmp.ge.s32.totalorder %s27_s17, 2  ;;  %p96_p1 = scmp.ne.s32.totalorder %s520_s11, %s516_s10 }
   0x7   : > { %p97_p2 = scmp.eq.s32.totalorder %s368_s15, 1  ;;  %p102_p3 = scmp.ne.s32.totalorder %s516_s10, %s512_s9 }
   0x8   : > { %s683_s17 = smov (%p29_p0, %s27_s17), 0  ;;  %p103_p5 = scmp.eq.s32.totalorder %s369_s16, 1 }
   0x9   : > { %p594_p4 = por %p97_p2, %p96_p1  ;;  %s83_s20 = ssub.s32 %s528_s13, %s683_s17 }
   0xa   : > { %p373_p6 = scmp.ge.s32.totalorder %s532_s14, 1  ;;  %p84_p7 = scmp.eq.s32.totalorder %s83_s20, 0 }
   0xb   : > { %p601_p8 = por %p103_p5, %p102_p3  ;;  %p137_p9 = scmp.lt.s32.totalorder %s532_s14, 3 }
   0xc   : > { %s607_s22 = scalar_select %p84_p7, %s520_s11, %s86_s18  }
   0xd   : > { %p138_p10 = pnand %p373_p6, %p137_p9 }
   0xe   : > { %p163_p11 = scmp.lt.s32.totalorder (!%p138_p10), %s524_s12, 1  ;;  %v184_v0 = vld [vmem:[%s673_s1] sm:$0xff] (!%p138_p10)  ;;  %v185_v1 = vld [vmem:[%s673_s1 + $0x8] sm:$0xff] (!%p138_p10)  ;;  %v534_v2 = vmov (!%p138_p10), 0   ;;  %v535_v3 = vmov (!%p138_p10), 0.0|0.0   ;;  %vm536_vm0 = vmmov (!%p138_p10), 0   ;;  %v177_v7 = vlaneseq (!%p138_p10) }
   0xf   : > { %141 = sbr.rel (%p138_p10) target bundleno = 383 (0x17f), region = 28  ;;  %453 = vset.pattern.permute.xlu0 (!%p138_p10), %v534_v2  ;;  %391 = vmatprep.subr.bf16.mxu0 (!%p138_p10), %v535_v3  ;;  %v392_v4 = vpack.c.bf16 (!%p138_p10), %v185_v1, %v184_v0  ;;  %v537_v6 = vmov (!%p138_p10), 0.0   ;;  %vm186_vm1 = vcmask (!%p138_p10), 130048   ;;  %s160_s4 = sand.u32 (!%p138_p10), 1, %s516_s10  }
  0x10   : > { %388 = vmatprep.mubr.msk.f32.mxu0 (!%p138_p10), %vm536_vm0, %v537_v6  ;;  %v178_v8 = vand.u32 (!%p138_p10), 127, %v177_v7  ;;  %s374_s5 = sshll.u32 (!%p138_p10), %s160_s4, 3  ;;  %s378_s8 = sshll.u32 (!%p138_p10), %s524_s12, 7 }
  0x11   : > { %393 = vmatpush3.bf16.msra.mxu0 (!%p138_p10), %v392_v4  ;;  %s162_s6 = scalar_lea.vmem (!%p138_p10), [#allocation2], %s374_s5  ;;  %s627_s18 = scalar_lea.hbm (!%p138_p10), %s674_s2, %s378_s8 }
  0x12   : > { %s286_s7 = sshll.u32 (!%p138_p10), %s162_s6, 4  ;;  %s273_s20 = scalar_lea.sflag (!%p138_p10), [#allocation3], %s160_s4  ;;  %s622_s7 = int_to_ptr.vmem [resolvable:$true] %s286_s7 }
  0x13   : > { %s454_s23 = scalar_lea.vmem (!%p138_p10), %s622_s7, 128 }
  0x14   : > { %p455_p12 = scmp.ne.s32.totalorder (!%p138_p10), %s622_s7, %s454_s23 }
  0x16   : > { %s164_s27 = scalar_select %p163_p11, %s524_s12, 1 }
  0x17   : > { %p456_p13 = pnand %p455_p12, %p594_p4  ;;  %s538_s12 = smov [#allocation2]  }
  0x18   : > { %s375_s28 = sshll.u32 %s164_s27, 3  ;;  %s458_s24 = sshll.u32 %s538_s12, 4  ;;  %s459_s24 = int_to_ptr.vmem [resolvable:$false] %s458_s24 }
  0x19   : > { %s166_s3 = scalar_lea.vmem %s672_s0, %s375_s28  ;;  %p457_p0 = pneg %p456_p13 }
  0x1a   : > { %v173_v5 = vld [vmem:[%s166_s3] sm:$0xff]  ;;  %s460_s25 = scalar_lea.vmem %s459_s24, 256  ;;  %p461_p1 = scmp.lt.s32.totalorder %s622_s7, %s459_s24 }
  0x1b   : > { %180 = vperm.xlu0 %453, %v173_v5   ;;  %p462_p2 = scmp.lt.s32.totalorder %s460_s25, %s454_s23 }
  0x1d   : > { %p463_p3 = por %p462_p2, %p461_p1 }
  0x1f   : > { %p464_p5 = pnand %p463_p3, %p457_p0 }
  0x9a   : > { %v181_v9 = vpop.permute.xlu0 %180 }
  0x9b   : > { %vm182_vm2 = vcmp.eq.s32.totalorder %v178_v8, %v181_v9 }
  0x9c   : > { %v183_v10 = vsel %vm182_vm2, 1.0, %v537_v6 }
  0x9d   : > { %389 = vmatmul.mubr.msk.f32.vlgmr.msra.gmra.mrb[0].mxu0 %vm186_vm1, %v183_v10 }
 0x170   : > { %v256_v11 = vpop.f32.mrb[0].mxu0 }
 0x171   : > { %264 = vst [vmem:[%s162_s6] sm:$0xff] %v256_v11  ;;  %v390_v12 = vpop.f32.mrb[1].mxu0 }
 0x172   : > { %467 = shalt.err (!%p464_p5)
}
 0x173   : > { %s468_s26 = scalar_lea.hbm %s627_s18, 128  ;;  %s472_s29 = scalar_lea.hbm %s674_s2, 256 }
 0x174   : > { %p469_p6 = scmp.ne.s32.totalorder %s627_s18, %s468_s26  ;;  %p473_p10 = scmp.lt.u32.totalorder %s627_s18, %s674_s2 }
 0x175   : > { %p474_p11 = scmp.lt.u32.totalorder %s472_s29, %s468_s26  ;;  %p476_p13 = scmp.lt.u32.totalorder %s468_s26, %s627_s18 }
 0x176   : > { %p470_p7 = pnand %p469_p6, %p594_p4 }
 0x177   : > { %p475_p12 = por %p474_p11, %p473_p10 }
 0x178   : > { %p471_p9 = pneg %p470_p7 }
 0x179   : > { %p477_p0 = por %p476_p13, %p475_p12 }
 0x17b   : > { %p478_p1 = pnand %p477_p0, %p471_p9 }
 0x17d   : > { %481 = shalt.err (!%p478_p1)
}
 0x17e   : > { %394 = dma.vmem_to_hbm [thread:$0]  (%p594_p4), %s622_s7, 128, %s627_s18, %s273_s20  }
 0x17f PF: > { %p400_p2 = scmp.ge.s32.totalorder %s532_s14, 2  ;;  %s298_s4 = sand.u32 1, %s512_s9  }
 0x180   : > { %s299_s5 = scalar_lea.sflag [#allocation3], %s298_s4 }
 0x181   : > { %p397_p3 = pnand %p400_p2, %p601_p8 }
 0x183   : > { %507 = dma.done.wait (!%p397_p3), %s299_s5, 128  }
 0x184   : > { %509 = vsyncadd (!%p397_p3), %s299_s5, 4294967168  ;;  %s15_s14 = sadd.s32 1, %s532_s14   ;;  %s677_s9 = smov %s516_s10 }
 0x185   : > { %p12_p5 = scmp.ge.s32.totalorder %s15_s14, 4   ;;  %s678_s10 = smov %s520_s11 }
 0x186   : > { %s679_s11 = smov %s607_s22  ;;  %s680_s12 = smov %s528_s13 }
 0x187   : > { %s681_s13 = smov %s683_s17  ;;  %14 = sbr.rel (!%p12_p5) target bundleno = 4 (0x4), region = 74 }
 0x18e   :  { %304 = vsyncpa [#allocation3], 1 }
 0x18f   :  { %306 = vsyncpa [#allocation3 + $0x1], 1 }

// kernel: tpu_custom_call.1
= control target key start
LH: loop header
LB: loop body
LE: loop exit
PB: predicated region body
PF: predicated region fallthrough
CT: control target
= control target key end

     0   :  { %7 = vsyncpa [#allocation3], 0  ;;  %s672_s0 = inlined_call_operand.vmem [shape: s32[16,1], index: 0, kind: input, shape index: {}]   ;;  %s673_s1 = inlined_call_operand.vmem [shape: f32[16,128], index: 1, kind: input, shape index: {}]   ;;  %s674_s2 = inlined_call_operand.hbm [shape: f32[16,128], index: 2, kind: output, shape index: {}]  }
   0x1   :  { %9 = vsyncpa [#allocation3 + $0x1], 0  ;;  %s554_s9 = smov 0   ;;  %s556_s10 = smov 0  }
   0x2   :  { %s558_s11 = smov 0   ;;  %s560_s12 = smov 0  }
   0x3   :  { %s562_s13 = smov 0   ;;  %s564_s14 = smov 0  }
   0x4 LB: > { %s368_s15 = sadd.s32 4294967295, %s532_s14   ;;  %s369_s16 = sadd.s32 4294967294, %s532_s14   ;;  %s532_s14 = sphi %s564_s14, %s15_s14   ;;  %s528_s13 = sphi %s562_s13, %s681_s13   ;;  %s524_s12 = sphi %s560_s12, %s680_s12   ;;  %s520_s11 = sphi %s558_s11, %s679_s11   ;;  %s516_s10 = sphi %s556_s10, %s678_s10   ;;  %s512_s9 = sphi %s554_s9, %s677_s9  }
   0x5   : > { %s27_s17 = sadd.s32 1, %s528_s13  ;;  %s86_s18 = sadd.s32 1, %s520_s11 }
   0x6   : > { %p29_p0 = scmp.ge.s32.totalorder %s27_s17, 2  ;;  %p96_p1 = scmp.ne.s32.totalorder %s520_s11, %s516_s10 }
   0x7   : > { %p97_p2 = scmp.eq.s32.totalorder %s368_s15, 1  ;;  %p102_p3 = scmp.ne.s32.totalorder %s516_s10, %s512_s9 }
   0x8   : > { %s683_s17 = smov (%p29_p0, %s27_s17), 0  ;;  %p103_p5 = scmp.eq.s32.totalorder %s369_s16, 1 }
   0x9   : > { %p594_p4 = por %p97_p2, %p96_p1  ;;  %s83_s20 = ssub.s32 %s528_s13, %s683_s17 }
   0xa   : > { %p373_p6 = scmp.ge.s32.totalorder %s532_s14, 1  ;;  %p84_p7 = scmp.eq.s32.totalorder %s83_s20, 0 }
   0xb   : > { %p601_p8 = por %p103_p5, %p102_p3  ;;  %p137_p9 = scmp.lt.s32.totalorder %s532_s14, 3 }
   0xc   : > { %s607_s22 = scalar_select %p84_p7, %s520_s11, %s86_s18  }
   0xd   : > { %p138_p10 = pnand %p373_p6, %p137_p9 }
   0xe   : > { %p163_p11 = scmp.lt.s32.totalorder (!%p138_p10), %s524_s12, 1  ;;  %v184_v0 = vld [vmem:[%s673_s1] sm:$0xff] (!%p138_p10)  ;;  %v185_v1 = vld [vmem:[%s673_s1 + $0x8] sm:$0xff] (!%p138_p10)  ;;  %v534_v2 = vmov (!%p138_p10), 0   ;;  %v535_v3 = vmov (!%p138_p10), 0.0|0.0   ;;  %vm536_vm0 = vmmov (!%p138_p10), 0   ;;  %v177_v7 = vlaneseq (!%p138_p10) }
   0xf   : > { %141 = sbr.rel (%p138_p10) target bundleno = 383 (0x17f), region = 28  ;;  %453 = vset.pattern.permute.xlu0 (!%p138_p10), %v534_v2  ;;  %391 = vmatprep.subr.bf16.mxu0 (!%p138_p10), %v535_v3  ;;  %v392_v4 = vpack.c.bf16 (!%p138_p10), %v185_v1, %v184_v0  ;;  %v537_v6 = vmov (!%p138_p10), 0.0   ;;  %vm186_vm1 = vcmask (!%p138_p10), 130048   ;;  %s160_s4 = sand.u32 (!%p138_p10), 1, %s516_s10  }
  0x10   : > { %388 = vmatprep.mubr.msk.f32.mxu0 (!%p138_p10), %vm536_vm0, %v537_v6  ;;  %v178_v8 = vand.u32 (!%p138_p10), 127, %v177_v7  ;;  %s374_s5 = sshll.u32 (!%p138_p10), %s160_s4, 3  ;;  %s378_s8 = sshll.u32 (!%p138_p10), %s524_s12, 7 }
  0x11   : > { %393 = vmatpush3.bf16.msra.mxu0 (!%p138_p10), %v392_v4  ;;  %s162_s6 = scalar_lea.vmem (!%p138_p10), [#allocation2], %s374_s5  ;;  %s627_s18 = scalar_lea.hbm (!%p138_p10), %s674_s2, %s378_s8 }
  0x12   : > { %s286_s7 = sshll.u32 (!%p138_p10), %s162_s6, 4  ;;  %s273_s20 = scalar_lea.sflag (!%p138_p10), [#allocation3], %s160_s4  ;;  %s622_s7 = int_to_ptr.vmem [resolvable:$true] %s286_s7 }
  0x13   : > { %s454_s23 = scalar_lea.vmem (!%p138_p10), %s622_s7, 128 }
  0x14   : > { %p455_p12 = scmp.ne.s32.totalorder (!%p138_p10), %s622_s7, %s454_s23 }
  0x16   : > { %s164_s27 = scalar_select %p163_p11, %s524_s12, 1 }
  0x17   : > { %p456_p13 = pnand %p455_p12, %p594_p4  ;;  %s538_s12 = smov [#allocation2]  }
  0x18   : > { %s375_s28 = sshll.u32 %s164_s27, 3  ;;  %s458_s24 = sshll.u32 %s538_s12, 4  ;;  %s459_s24 = int_to_ptr.vmem [resolvable:$false] %s458_s24 }
  0x19   : > { %s166_s3 = scalar_lea.vmem %s672_s0, %s375_s28  ;;  %p457_p0 = pneg %p456_p13 }
  0x1a   : > { %v173_v5 = vld [vmem:[%s166_s3] sm:$0xff]  ;;  %s460_s25 = scalar_lea.vmem %s459_s24, 256  ;;  %p461_p1 = scmp.lt.s32.totalorder %s622_s7, %s459_s24 }
  0x1b   : > { %180 = vperm.xlu0 %453, %v173_v5   ;;  %p462_p2 = scmp.lt.s32.totalorder %s460_s25, %s454_s23 }
  0x1d   : > { %p463_p3 = por %p462_p2, %p461_p1 }
  0x1f   : > { %p464_p5 = pnand %p463_p3, %p457_p0 }
  0x9a   : > { %v181_v9 = vpop.permute.xlu0 %180 }
  0x9b   : > { %vm182_vm2 = vcmp.eq.s32.totalorder %v178_v8, %v181_v9 }
  0x9c   : > { %v183_v10 = vsel %vm182_vm2, 1.0, %v537_v6 }
  0x9d   : > { %389 = vmatmul.mubr.msk.f32.vlgmr.msra.gmra.mrb[0].mxu0 %vm186_vm1, %v183_v10 }
 0x170   : > { %v256_v11 = vpop.f32.mrb[0].mxu0 }
 0x171   : > { %264 = vst [vmem:[%s162_s6] sm:$0xff] %v256_v11  ;;  %v390_v12 = vpop.f32.mrb[1].mxu0 }
 0x172   : > { %467 = shalt.err (!%p464_p5)
}
 0x173   : > { %s468_s26 = scalar_lea.hbm %s627_s18, 128  ;;  %s472_s29 = scalar_lea.hbm %s674_s2, 256 }
 0x174   : > { %p469_p6 = scmp.ne.s32.totalorder %s627_s18, %s468_s26  ;;  %p473_p10 = scmp.lt.u32.totalorder %s627_s18, %s674_s2 }
 0x175   : > { %p474_p11 = scmp.lt.u32.totalorder %s472_s29, %s468_s26  ;;  %p476_p13 = scmp.lt.u32.totalorder %s468_s26, %s627_s18 }
 0x176   : > { %p470_p7 = pnand %p469_p6, %p594_p4 }
 0x177   : > { %p475_p12 = por %p474_p11, %p473_p10 }
 0x178   : > { %p471_p9 = pneg %p470_p7 }
 0x179   : > { %p477_p0 = por %p476_p13, %p475_p12 }
 0x17b   : > { %p478_p1 = pnand %p477_p0, %p471_p9 }
 0x17d   : > { %481 = shalt.err (!%p478_p1)
}
 0x17e   : > { %394 = dma.vmem_to_hbm [thread:$0]  (%p594_p4), %s622_s7, 128, %s627_s18, %s273_s20  }
 0x17f PF: > { %p400_p2 = scmp.ge.s32.totalorder %s532_s14, 2  ;;  %s298_s4 = sand.u32 1, %s512_s9  }
 0x180   : > { %s299_s5 = scalar_lea.sflag [#allocation3], %s298_s4 }
 0x181   : > { %p397_p3 = pnand %p400_p2, %p601_p8 }
 0x183   : > { %507 = dma.done.wait (!%p397_p3), %s299_s5, 128  }
 0x184   : > { %509 = vsyncadd (!%p397_p3), %s299_s5, 4294967168  ;;  %s15_s14 = sadd.s32 1, %s532_s14   ;;  %s677_s9 = smov %s516_s10 }
 0x185   : > { %p12_p5 = scmp.ge.s32.totalorder %s15_s14, 4   ;;  %s678_s10 = smov %s520_s11 }
 0x186   : > { %s679_s11 = smov %s607_s22  ;;  %s680_s12 = smov %s528_s13 }
 0x187   : > { %s681_s13 = smov %s683_s17  ;;  %14 = sbr.rel (!%p12_p5) target bundleno = 4 (0x4), region = 74 }
 0x18e   :  { %304 = vsyncpa [#allocation3], 1 }
 0x18f   :  { %306 = vsyncpa [#allocation3 + $0x1], 1 }

</bundles_post_ra>
